<compile_context>
chip_gen: v5e
topology: v5e:2x2
jax: 0.10.0
libtpu: 0.0.40
codegen_flags: <defaults>
</compile_context>

<pallas_src>
import functools

import numpy as np
import jax
import jax.numpy as jnp
from jax.experimental import pallas as pl
from jax.experimental.pallas import tpu as pltpu


def _round_up(x, m):
    return (x + m - 1) // m * m


def _pad_axis(a, axis, multiple):
    pad = (-a.shape[axis]) % multiple
    if pad == 0:
        return a
    widths = [(0, 0)] * a.ndim
    widths[axis] = (0, pad)
    return jnp.pad(a, widths)


# --------------------------------------------------------------------------------------
# Kernel 1: per node tile, per Fin (K) tile:
#   acc_b += X_tile @ basis_b                      (B matmuls, f32 accumulation)
# last K tile: XW[r] = sum_b coeff[r,b] * acc_b    (combine ONCE per node tile, emit bf16)
# --------------------------------------------------------------------------------------
def xw_kernel(coeff_ref, x_ref, basis_ref, xw_ref, acc_ref):
    # coeff_ref: [R, B] f32 (SMEM)        x_ref:     [tile_n, tile_fin] f32
    # basis_ref: [B, tile_fin, Foutp] f32 xw_ref:    [R, tile_n, Foutp] bf16 (out)
    # acc_ref:   [B, tile_n, Foutp] f32   (VMEM scratch: per-basis partials)
    kin = pl.program_id(1)
    num_bases = basis_ref.shape[0]
    num_rels = xw_ref.shape[0]

    @pl.when(kin == 0)
    def _init():
        acc_ref[...] = jnp.zeros_like(acc_ref)

    for b in range(num_bases):
        acc_ref[b] += jnp.dot(x_ref[...], basis_ref[b],
                              preferred_element_type=jnp.float32)

    @pl.when(kin == pl.num_programs(1) - 1)
    def _finish():
        for r in range(num_rels):
            m = coeff_ref[r, 0] * acc_ref[0]
            for b in range(1, num_bases):
                m += coeff_ref[r, b] * acc_ref[b]
            xw_ref[r] = m.astype(xw_ref.dtype)


# --------------------------------------------------------------------------------------
# Kernel 2: per (dst-node tile i, relation r, nonzero-block slot k):
#   o_tile += A_scaled_r[i, kblk] @ XW_r[kblk]        (bf16 MXU, f32 resident accumulator)
# A_scaled already carries norm='right' 1/in-degree.  Padded block slots are skipped.
# final (r, k): o_tile = relu(o_tile + bias)
# --------------------------------------------------------------------------------------
def rel_agg_kernel(kblk_ref, nnz_ref, a_ref, xw_ref, bias_ref, o_ref, *, num_rels):
    del kblk_ref  # only consumed by the index_maps
    i = pl.program_id(0)
    r = pl.program_id(1)
    k = pl.program_id(2)

    @pl.when(jnp.logical_and(r == 0, k == 0))
    def _init():
        o_ref[...] = jnp.zeros_like(o_ref)

    # block-sparse skip: only the first nnz[i, r] entries of the block list are real
    @pl.when(k < nnz_ref[i * num_rels + r])
    def _accumulate():
        o_ref[...] += jnp.dot(a_ref[...], xw_ref[...],
                              preferred_element_type=jnp.float32)

    @pl.when(jnp.logical_and(r == pl.num_programs(1) - 1,
                             k == pl.num_programs(2) - 1))
    def _finish():
        h = o_ref[...] + bias_ref[...]                      # h_bias
        o_ref[...] = jnp.maximum(h, 0.0)                    # ReLU; dropout(p=0) == identity


# --------------------------------------------------------------------------------------
# One-time per-graph preprocessing (host side): pad, fold 1/in-degree into A, cast to bf16,
# and build per-(dst-tile, relation) lists of nonzero (tile_m x tile_k) adjacency blocks.
# --------------------------------------------------------------------------------------
def prepare_graph(adj, *, tile_m=128, tile_k=128):
    adj = np.asarray(adj, np.float32)                       # [R, N, N] dense 0/1, dst x src
    R, N, _ = adj.shape
    Nm = _round_up(N, tile_m)
    Nk = _round_up(N, tile_k)

    adj_p = np.zeros((R, Nm, Nk), np.float32)
    adj_p[:, :N, :N] = adj
    deg = adj_p.sum(axis=-1, keepdims=True)
    inv_deg = 1.0 / np.maximum(deg, 1.0)                    # norm='right', clamped >= 1
    adj_scaled = adj_p * inv_deg                            # fold normalization into A

    n_i, n_k = Nm // tile_m, Nk // tile_k
    blk_nz = adj_p.reshape(R, n_i, tile_m, n_k, tile_k).sum(axis=(2, 4)) > 0.0  # [R, nI, nK]
    max_nnz = max(int(blk_nz.sum(axis=-1).max()), 1)

    kblk = np.zeros((n_i, R, max_nnz), np.int32)
    nnz = np.zeros((n_i, R), np.int32)
    for i in range(n_i):
        for r in range(R):
            ks = np.nonzero(blk_nz[r, i])[0].astype(np.int32)
            nnz[i, r] = ks.size
            if ks.size:
                kblk[i, r, :ks.size] = ks
                kblk[i, r, ks.size:] = ks[-1]   # repeat last valid index -> DMA is skipped

    return {
        "adj": jnp.asarray(adj_scaled, jnp.bfloat16),       # [R, Nm, Nk], inv-degree folded in
        "kblk": jnp.asarray(kblk.reshape(-1)),              # flat int32 (cheap SMEM layout)
        "nnz": jnp.asarray(nnz.reshape(-1)),                # flat int32
        "num_nodes": N, "num_rels": R, "nm": Nm, "nk": Nk,
        "max_nnz": max_nnz, "tile_m": tile_m, "tile_k": tile_k,
    }


# --------------------------------------------------------------------------------------
# Layer forward
# --------------------------------------------------------------------------------------
def rel_graph_conv_layer(graph, x, basis, coeff, bias, *, tile_fin=128, lane=128):
    """R-GCN layer forward.

    graph: output of prepare_graph()                (static per-graph structures)
    x:     [N, Fin]       f32 node features
    basis: [B, Fin, Fout] f32 weight bases
    coeff: [R, B]         f32 per-relation basis coefficients
    bias:  [Fout]         f32
    returns [N, Fout] f32
    """
    N, R = graph["num_nodes"], graph["num_rels"]
    Nm, Nk = graph["nm"], graph["nk"]
    tile_m, tile_k = graph["tile_m"], graph["tile_k"]
    max_nnz = graph["max_nnz"]
    B, Fin, Fout = basis.shape

    # Lane-dense / tileable zero padding (padded rows/cols contribute nothing).
    x_p = _pad_axis(_pad_axis(x, 0, tile_k), 1, tile_fin)          # [Nk, Finp]
    basis_p = _pad_axis(_pad_axis(basis, 1, tile_fin), 2, lane)    # [B, Finp, Foutp]
    bias_p = _pad_axis(bias, 0, lane).reshape(1, -1)               # [1, Foutp]
    Finp = x_p.shape[1]
    Foutp = basis_p.shape[2]

    # ---- kernel 1: XW[r] = X @ (sum_b coeff[r,b]*basis_b), emitted in bf16 ----
    xw = pl.pallas_call(
        xw_kernel,
        out_shape=jax.ShapeDtypeStruct((R, Nk, Foutp), jnp.bfloat16),
        grid_spec=pltpu.PrefetchScalarGridSpec(
            num_scalar_prefetch=0,
            grid=(Nk // tile_k, Finp // tile_fin),                 # (node tiles, Fin reduction)
            in_specs=[
                pl.BlockSpec(memory_space=pltpu.MemorySpace.SMEM),          # coeff [R, B]
                pl.BlockSpec((tile_k, tile_fin), lambda n, f: (n, f)),      # X tile
                pl.BlockSpec((B, tile_fin, Foutp), lambda n, f: (0, f, 0)), # bases K-slice
            ],
            out_specs=pl.BlockSpec((R, tile_k, Foutp), lambda n, f: (0, n, 0)),
            scratch_shapes=[pltpu.VMEM((B, tile_k, Foutp), jnp.float32)],
        ),
        compiler_params=pltpu.CompilerParams(
            dimension_semantics=("parallel", "arbitrary")),
    )(coeff, x_p, basis_p)

    # ---- kernel 2: block-sparse relation aggregation into a resident f32 accumulator ----
    def a_index(i, r, k, kblk, nnz):
        return (r, i, kblk[(i * R + r) * max_nnz + k])

    def xw_index(i, r, k, kblk, nnz):
        return (r, kblk[(i * R + r) * max_nnz + k], 0)

    out_p = pl.pallas_call(
        functools.partial(rel_agg_kernel, num_rels=R),
        out_shape=jax.ShapeDtypeStruct((Nm, Foutp), jnp.float32),
        grid_spec=pltpu.PrefetchScalarGridSpec(
            num_scalar_prefetch=2,                                 # kblk, nnz into SMEM
            grid=(Nm // tile_m, R, max_nnz),                       # reduction axes (r, k) last
            in_specs=[
                pl.BlockSpec((pl.Squeezed(), tile_m, tile_k), a_index),   # A_scaled block (bf16)
                pl.BlockSpec((pl.Squeezed(), tile_k, Foutp), xw_index),   # XW_r K-slice (bf16)
                pl.BlockSpec((1, Foutp), lambda i, r, k, kblk, nnz: (0, 0)),  # bias
            ],
            out_specs=pl.BlockSpec((tile_m, Foutp),
                                   lambda i, r, k, kblk, nnz: (i, 0)),    # resident accumulator
        ),
        compiler_params=pltpu.CompilerParams(
            dimension_semantics=("parallel", "arbitrary", "arbitrary")),
    )(graph["kblk"], graph["nnz"], graph["adj"], xw, bias_p)

    return out_p[:N, :Fout]


def _xavier_uniform(key, shape, gain):
    fan_in, fan_out = shape[-2], shape[-1]
    limit = gain * jnp.sqrt(6.0 / (fan_in + fan_out))
    return jax.random.uniform(key, shape, jnp.float32, -limit, limit)


if __name__ == "__main__":
    # Small, deterministic synthetic setup (lane-dense feature dims, tileable node count).
    N = 256            # number of nodes (single node type)
    IN_FEAT = 128
    OUT_FEAT = 128
    rel_names = ("writes", "cites", "likes")
    R = len(rel_names)
    NUM_BASES = 2      # num_bases < len(rel_names) -> basis decomposition path

    key = jax.random.PRNGKey(0)
    k_feat, k_adj, k_basis, k_coeff = jax.random.split(key, 4)

    # Node features.
    x = jax.random.normal(k_feat, (N, IN_FEAT), jnp.float32)

    # Random per-relation dense adjacency (dst x src), ~10% density.
    adj = (jax.random.uniform(k_adj, (R, N, N)) < 0.1).astype(jnp.float32)

    # Parameters (xavier_uniform with gain = calculate_gain('relu') = sqrt(2)).
    gain = jnp.sqrt(2.0)
    basis = _xavier_uniform(k_basis, (NUM_BASES, IN_FEAT, OUT_FEAT), gain)   # WeightBasis.weight
    coeff = _xavier_uniform(k_coeff, (R, NUM_BASES), gain)                   # WeightBasis.w_comp
    bias = jnp.zeros((OUT_FEAT,), jnp.float32)                               # h_bias init zeros

    # One-time graph preprocessing (pad + fold 1/in-degree + bf16 + nonzero-block lists).
    graph = prepare_graph(np.asarray(adj), tile_m=128, tile_k=128)

    out = rel_graph_conv_layer(graph, x, basis, coeff, bias)
    out = jax.block_until_ready(out)

    # Pure-JAX f32 reference of the same semantics (weights composed from bases).
    weights = jnp.einsum("rb,bio->rio", coeff, basis)                        # W_r
    deg = jnp.maximum(adj.sum(-1, keepdims=True), 1.0)                       # [R, N, 1]
    ref = jnp.einsum("rij,jk->rik", adj, x)                                  # aggregate
    ref = jnp.einsum("rik,rko->rio", ref / deg, weights).sum(0)              # norm, W_r, sum rels
    ref = jnp.maximum(ref + bias[None, :], 0.0)

    # Effective weight/adjacency precision is bf16 (XW and inv-degree-scaled A are bf16 for the
    # MXU dot, f32 accumulation) -> loosen tolerance vs the f32 reference.
    assert jnp.allclose(out, ref, atol=2e-2, rtol=2e-2), float(jnp.max(jnp.abs(out - ref)))
    print("KERNEL_OK")
</pallas_src>

<mosaic_0001>
module attributes {stable_mosaic.version = 11 : i64} {
  func.func @xw_kernel(%arg0: i32, %arg1: i32, %arg2: memref<3x2xf32, #tpu.memory_space<smem>>, %arg3: memref<128x128xf32, #tpu.memory_space<vmem>>, %arg4: memref<2x128x128xf32, #tpu.memory_space<vmem>>, %arg5: memref<3x128x128xbf16, #tpu.memory_space<vmem>>, %arg6: memref<2x128x128xf32, #tpu.memory_space<vmem>>) attributes {dimension_semantics = [#tpu.dimension_semantics<parallel>, #tpu.dimension_semantics<arbitrary>], iteration_bounds = array<i64: 2, 1>, scalar_prefetch = 0 : i64, scratch_operands = 1 : i64, tpu.core_type = #tpu.core_type<tc>, window_params = [{transform_indices = @transform_0, window_bounds = array<i64: 3, 2>}, {transform_indices = @transform_1, window_bounds = array<i64: 128, 128>}, {transform_indices = @transform_2, window_bounds = array<i64: 2, 128, 128>}, {transform_indices = @transform_3, window_bounds = array<i64: 3, 128, 128>}]} {
    %c0_i32 = arith.constant 0 : i32
    %0 = arith.cmpi eq, %arg1, %c0_i32 : i32
    %1 = arith.extui %0 : i1 to i32
    %c0_i32_0 = arith.constant 0 : i32
    %2 = arith.cmpi ne, %1, %c0_i32_0 : i32
    scf.if %2 {
      %cst_24 = arith.constant 0.000000e+00 : f32
      %26 = vector.broadcast %cst_24 : f32 to vector<2x128x128xf32>
      %c0_25 = arith.constant 0 : index
      %c0_26 = arith.constant 0 : index
      %c0_27 = arith.constant 0 : index
      %27 = vector.load %arg6[%c0_25, %c0_26, %c0_27] : memref<2x128x128xf32, #tpu.memory_space<vmem>>, vector<2x128x128xf32>
      tpu.vector_store %arg6[%c0_25, %c0_26, %c0_27], %26 {strides = array<i32>} : memref<2x128x128xf32, #tpu.memory_space<vmem>>, vector<2x128x128xf32>,
    } else {
    }
    %c0 = arith.constant 0 : index
    %c0_1 = arith.constant 0 : index
    %c0_2 = arith.constant 0 : index
    %3 = vector.load %arg6[%c0, %c0_1, %c0_2] : memref<2x128x128xf32, #tpu.memory_space<vmem>>, vector<1x128x128xf32>
    %4 = vector.shape_cast %3 : vector<1x128x128xf32> to vector<128x128xf32>
    %c0_3 = arith.constant 0 : index
    %c0_4 = arith.constant 0 : index
    %5 = vector.load %arg3[%c0_3, %c0_4] : memref<128x128xf32, #tpu.memory_space<vmem>>, vector<128x128xf32>
    %c0_5 = arith.constant 0 : index
    %c0_6 = arith.constant 0 : index
    %c0_7 = arith.constant 0 : index
    %6 = vector.load %arg4[%c0_5, %c0_6, %c0_7] : memref<2x128x128xf32, #tpu.memory_space<vmem>>, vector<1x128x128xf32>
    %7 = vector.shape_cast %6 : vector<1x128x128xf32> to vector<128x128xf32>
    %cst = arith.constant dense<0.000000e+00> : vector<128x128xf32>
    %8 = tpu.matmul %5, %7, %cst {dimension_numbers = #tpu.dot_dimension_numbers<[1], [0], [0], [1], [0, 0, 1, 1], [], []>} : vector<128x128xf32>, vector<128x128xf32>, vector<128x128xf32> -> vector<128x128xf32>
    %9 = arith.addf %4, %8 : vector<128x128xf32>
    %c0_8 = arith.constant 0 : index
    %c0_9 = arith.constant 0 : index
    %c0_10 = arith.constant 0 : index
    %10 = vector.load %arg6[%c0_8, %c0_9, %c0_10] : memref<2x128x128xf32, #tpu.memory_space<vmem>>, vector<1x128x128xf32>
    %11 = vector.shape_cast %10 : vector<1x128x128xf32> to vector<128x128xf32>
    %12 = vector.shape_cast %9 : vector<128x128xf32> to vector<1x128x128xf32>
    tpu.vector_store %arg6[%c0_8, %c0_9, %c0_10], %12 {strides = array<i32>} : memref<2x128x128xf32, #tpu.memory_space<vmem>>, vector<1x128x128xf32>,
    %c1 = arith.constant 1 : index
    %c0_11 = arith.constant 0 : index
    %c0_12 = arith.constant 0 : index
    %13 = vector.load %arg6[%c1, %c0_11, %c0_12] : memref<2x128x128xf32, #tpu.memory_space<vmem>>, vector<1x128x128xf32>
    %14 = vector.shape_cast %13 : vector<1x128x128xf32> to vector<128x128xf32>
    %c0_13 = arith.constant 0 : index
    %c0_14 = arith.constant 0 : index
    %15 = vector.load %arg3[%c0_13, %c0_14] : memref<128x128xf32, #tpu.memory_space<vmem>>, vector<128x128xf32>
    %c1_15 = arith.constant 1 : index
    %c0_16 = arith.constant 0 : index
    %c0_17 = arith.constant 0 : index
    %16 = vector.load %arg4[%c1_15, %c0_16, %c0_17] : memref<2x128x128xf32, #tpu.memory_space<vmem>>, vector<1x128x128xf32>
    %17 = vector.shape_cast %16 : vector<1x128x128xf32> to vector<128x128xf32>
    %cst_18 = arith.constant dense<0.000000e+00> : vector<128x128xf32>
    %18 = tpu.matmul %15, %17, %cst_18 {dimension_numbers = #tpu.dot_dimension_numbers<[1], [0], [0], [1], [0, 0, 1, 1], [], []>} : vector<128x128xf32>, vector<128x128xf32>, vector<128x128xf32> -> vector<128x128xf32>
    %19 = arith.addf %14, %18 : vector<128x128xf32>
    %c1_19 = arith.constant 1 : index
    %c0_20 = arith.constant 0 : index
    %c0_21 = arith.constant 0 : index
    %20 = vector.load %arg6[%c1_19, %c0_20, %c0_21] : memref<2x128x128xf32, #tpu.memory_space<vmem>>, vector<1x128x128xf32>
    %21 = vector.shape_cast %20 : vector<1x128x128xf32> to vector<128x128xf32>
    %22 = vector.shape_cast %19 : vector<128x128xf32> to vector<1x128x128xf32>
    tpu.vector_store %arg6[%c1_19, %c0_20, %c0_21], %22 {strides = array<i32>} : memref<2x128x128xf32, #tpu.memory_space<vmem>>, vector<1x128x128xf32>,
    %c0_i32_22 = arith.constant 0 : i32
    %23 = arith.cmpi eq, %arg1, %c0_i32_22 : i32
    %24 = arith.extui %23 : i1 to i32
    %c0_i32_23 = arith.constant 0 : i32
    %25 = arith.cmpi ne, %24, %c0_i32_23 : i32
    scf.if %25 {
      %c0_24 = arith.constant 0 : index
      %c0_25 = arith.constant 0 : index
      %26 = memref.load %arg2[%c0_24, %c0_25] : memref<3x2xf32, #tpu.memory_space<smem>>
      %c0_26 = arith.constant 0 : index
      %c0_27 = arith.constant 0 : index
      %c0_28 = arith.constant 0 : index
      %27 = vector.load %arg6[%c0_26, %c0_27, %c0_28] : memref<2x128x128xf32, #tpu.memory_space<vmem>>, vector<1x128x128xf32>
      %28 = vector.shape_cast %27 : vector<1x128x128xf32> to vector<128x128xf32>
      %29 = vector.broadcast %26 : f32 to vector<128x128xf32>
      %30 = arith.mulf %29, %28 : vector<128x128xf32>
      %c0_29 = arith.constant 0 : index
      %c1_30 = arith.constant 1 : index
      %31 = memref.load %arg2[%c0_29, %c1_30] : memref<3x2xf32, #tpu.memory_space<smem>>
      %c1_31 = arith.constant 1 : index
      %c0_32 = arith.constant 0 : index
      %c0_33 = arith.constant 0 : index
      %32 = vector.load %arg6[%c1_31, %c0_32, %c0_33] : memref<2x128x128xf32, #tpu.memory_space<vmem>>, vector<1x128x128xf32>
      %33 = vector.shape_cast %32 : vector<1x128x128xf32> to vector<128x128xf32>
      %34 = vector.broadcast %31 : f32 to vector<128x128xf32>
      %35 = arith.mulf %34, %33 : vector<128x128xf32>
      %36 = arith.addf %30, %35 : vector<128x128xf32>
      %37 = arith.truncf %36 : vector<128x128xf32> to vector<128x128xbf16>
      %c0_34 = arith.constant 0 : index
      %c0_35 = arith.constant 0 : index
      %c0_36 = arith.constant 0 : index
      %38 = vector.load %arg5[%c0_34, %c0_35, %c0_36] : memref<3x128x128xbf16, #tpu.memory_space<vmem>>, vector<1x128x128xbf16>
      %39 = vector.shape_cast %38 : vector<1x128x128xbf16> to vector<128x128xbf16>
      %40 = vector.shape_cast %37 : vector<128x128xbf16> to vector<1x128x128xbf16>
      tpu.vector_store %arg5[%c0_34, %c0_35, %c0_36], %40 {strides = array<i32>} : memref<3x128x128xbf16, #tpu.memory_space<vmem>>, vector<1x128x128xbf16>,
      %c1_37 = arith.constant 1 : index
      %c0_38 = arith.constant 0 : index
      %41 = memref.load %arg2[%c1_37, %c0_38] : memref<3x2xf32, #tpu.memory_space<smem>>
      %c0_39 = arith.constant 0 : index
      %c0_40 = arith.constant 0 : index
      %c0_41 = arith.constant 0 : index
      %42 = vector.load %arg6[%c0_39, %c0_40, %c0_41] : memref<2x128x128xf32, #tpu.memory_space<vmem>>, vector<1x128x128xf32>
      %43 = vector.shape_cast %42 : vector<1x128x128xf32> to vector<128x128xf32>
      %44 = vector.broadcast %41 : f32 to vector<128x128xf32>
      %45 = arith.mulf %44, %43 : vector<128x128xf32>
      %c1_42 = arith.constant 1 : index
      %c1_43 = arith.constant 1 : index
      %46 = memref.load %arg2[%c1_42, %c1_43] : memref<3x2xf32, #tpu.memory_space<smem>>
      %c1_44 = arith.constant 1 : index
      %c0_45 = arith.constant 0 : index
      %c0_46 = arith.constant 0 : index
      %47 = vector.load %arg6[%c1_44, %c0_45, %c0_46] : memref<2x128x128xf32, #tpu.memory_space<vmem>>, vector<1x128x128xf32>
      %48 = vector.shape_cast %47 : vector<1x128x128xf32> to vector<128x128xf32>
      %49 = vector.broadcast %46 : f32 to vector<128x128xf32>
      %50 = arith.mulf %49, %48 : vector<128x128xf32>
      %51 = arith.addf %45, %50 : vector<128x128xf32>
      %52 = arith.truncf %51 : vector<128x128xf32> to vector<128x128xbf16>
      %c1_47 = arith.constant 1 : index
      %c0_48 = arith.constant 0 : index
      %c0_49 = arith.constant 0 : index
      %53 = vector.load %arg5[%c1_47, %c0_48, %c0_49] : memref<3x128x128xbf16, #tpu.memory_space<vmem>>, vector<1x128x128xbf16>
      %54 = vector.shape_cast %53 : vector<1x128x128xbf16> to vector<128x128xbf16>
      %55 = vector.shape_cast %52 : vector<128x128xbf16> to vector<1x128x128xbf16>
      tpu.vector_store %arg5[%c1_47, %c0_48, %c0_49], %55 {strides = array<i32>} : memref<3x128x128xbf16, #tpu.memory_space<vmem>>, vector<1x128x128xbf16>,
      %c2 = arith.constant 2 : index
      %c0_50 = arith.constant 0 : index
      %56 = memref.load %arg2[%c2, %c0_50] : memref<3x2xf32, #tpu.memory_space<smem>>
      %c0_51 = arith.constant 0 : index
      %c0_52 = arith.constant 0 : index
      %c0_53 = arith.constant 0 : index
      %57 = vector.load %arg6[%c0_51, %c0_52, %c0_53] : memref<2x128x128xf32, #tpu.memory_space<vmem>>, vector<1x128x128xf32>
      %58 = vector.shape_cast %57 : vector<1x128x128xf32> to vector<128x128xf32>
      %59 = vector.broadcast %56 : f32 to vector<128x128xf32>
      %60 = arith.mulf %59, %58 : vector<128x128xf32>
      %c2_54 = arith.constant 2 : index
      %c1_55 = arith.constant 1 : index
      %61 = memref.load %arg2[%c2_54, %c1_55] : memref<3x2xf32, #tpu.memory_space<smem>>
      %c1_56 = arith.constant 1 : index
      %c0_57 = arith.constant 0 : index
      %c0_58 = arith.constant 0 : index
      %62 = vector.load %arg6[%c1_56, %c0_57, %c0_58] : memref<2x128x128xf32, #tpu.memory_space<vmem>>, vector<1x128x128xf32>
      %63 = vector.shape_cast %62 : vector<1x128x128xf32> to vector<128x128xf32>
      %64 = vector.broadcast %61 : f32 to vector<128x128xf32>
      %65 = arith.mulf %64, %63 : vector<128x128xf32>
      %66 = arith.addf %60, %65 : vector<128x128xf32>
      %67 = arith.truncf %66 : vector<128x128xf32> to vector<128x128xbf16>
      %c2_59 = arith.constant 2 : index
      %c0_60 = arith.constant 0 : index
      %c0_61 = arith.constant 0 : index
      %68 = vector.load %arg5[%c2_59, %c0_60, %c0_61] : memref<3x128x128xbf16, #tpu.memory_space<vmem>>, vector<1x128x128xbf16>
      %69 = vector.shape_cast %68 : vector<1x128x128xbf16> to vector<128x128xbf16>
      %70 = vector.shape_cast %67 : vector<128x128xbf16> to vector<1x128x128xbf16>
      tpu.vector_store %arg5[%c2_59, %c0_60, %c0_61], %70 {strides = array<i32>} : memref<3x128x128xbf16, #tpu.memory_space<vmem>>, vector<1x128x128xbf16>,
    } else {
    }
    return
  }
  func.func @transform_0(%arg0: i32, %arg1: i32) -> (i32, i32) {
    %c0_i32 = arith.constant 0 : i32
    %c0_i32_0 = arith.constant 0 : i32
    %c0_i32_1 = arith.constant 0 : i32
    return %c0_i32, %c0_i32_0 : i32, i32
  }
  func.func @transform_1(%arg0: i32, %arg1: i32) -> (i32, i32) {
    %c0_i32 = arith.constant 0 : i32
    return %arg0, %arg1 : i32, i32
  }
  func.func @transform_2(%arg0: i32, %arg1: i32) -> (i32, i32, i32) {
    %c0_i32 = arith.constant 0 : i32
    %c0_i32_0 = arith.constant 0 : i32
    %c0_i32_1 = arith.constant 0 : i32
    return %c0_i32, %arg1, %c0_i32_0 : i32, i32, i32
  }
  func.func @transform_3(%arg0: i32, %arg1: i32) -> (i32, i32, i32) {
    %c0_i32 = arith.constant 0 : i32
    %c0_i32_0 = arith.constant 0 : i32
    %c0_i32_1 = arith.constant 0 : i32
    return %c0_i32, %arg0, %c0_i32_0 : i32, i32, i32
  }
}

</mosaic_0001>

<bundles_post_ra>
// kernel: tpu_custom_call.1
= control target key start
LH: loop header
LB: loop body
LE: loop exit
PB: predicated region body
PF: predicated region fallthrough
CT: control target
= control target key end

     0   :  { %s1891_s0 = inlined_call_operand.vmem [shape: f32[3,2], index: 0, kind: input, shape index: {}]   ;;  %s1892_s1 = inlined_call_operand.hbm [shape: f32[256,128], index: 1, kind: input, shape index: {}]   ;;  %s1893_s2 = inlined_call_operand.hbm [shape: f32[2,128,128], index: 2, kind: input, shape index: {}]   ;;  %s1894_s3 = inlined_call_operand.hbm [shape: bf16[3,256,128], index: 3, kind: output, shape index: {}]  }
   0x1   :  { %1895 = sst [smem:[#allocation17_spill]] %s1891_s0 }
   0x2   :  { %8 = vsyncpa [#allocation6], 0 }
   0x3   :  { %9 = vsyncpa [#allocation4], 0 }
   0x4   :  { %11 = vsyncpa [#allocation4 + $0x1], 0 }
   0x5   :  { %12 = vsyncpa [#allocation9], 0 }
   0x6   :  { %13 = vsyncpa [#allocation5], 0 }
   0x7   :  { %15 = vsyncpa [#allocation5 + $0x1], 0  ;;  %s1575_s12 = smov 0   ;;  %s1577_s13 = smov 0  }
   0x8   :  { %s1579_s14 = smov 0   ;;  %s1581_s15 = smov 0  }
   0x9   :  { %s1583_s16 = smov 0   ;;  %s1585_s17 = smov 0  }
   0xa LB: > { %s1075_s18 = sadd.s32 4294967295, %s1542_s17   ;;  %s1076_s19 = sadd.s32 4294967294, %s1542_s17   ;;  %s1542_s17 = sphi %s1585_s17, %s21_s17   ;;  %s1538_s16 = sphi %s1583_s16, %s1908_s16   ;;  %s1534_s15 = sphi %s1581_s15, %s1907_s15   ;;  %s1530_s14 = sphi %s1579_s14, %s1906_s14   ;;  %s1526_s13 = sphi %s1577_s13, %s1905_s13   ;;  %s1522_s12 = sphi %s1575_s12, %s1904_s12  }
   0xb   : > { %s63_s20 = sadd.s32 1, %s1530_s14  ;;  %p70_p0 = scmp.ne.s32.totalorder %s1530_s14, %s1526_s13 }
   0xc   : > { %p71_p1 = scmp.eq.s32.totalorder %s1542_s17, 0  ;;  %p76_p2 = scmp.ne.s32.totalorder %s1526_s13, %s1522_s12 }
   0xd   : > { %p1613_p3 = scmp.eq.s32.totalorder %s1075_s18, 0  ;;  %p126_p4 = scmp.eq.s32.totalorder %s1075_s18, 1 }
   0xe   : > { %p1617_p5 = por %p71_p1, %p70_p0  ;;  %p132_p6 = scmp.eq.s32.totalorder %s1076_s19, 1 }
   0xf   : > { %p1623_p7 = por %p1613_p3, %p76_p2  ;;  %p1627_p8 = por %p126_p4, %p70_p0 }
  0x10   : > { %p1631_p9 = por %p132_p6, %p76_p2  ;;  %p1077_p10 = scmp.ge.s32.totalorder %s1542_s17, 1 }
  0x11   : > { %p139_p11 = scmp.lt.s32.totalorder %s1542_s17, 3  ;;  %s1901_s0 = sld [smem:[#allocation17_spill]] }
  0x12   : > { %p1080_p13 = scmp.ge.s32.totalorder %s1542_s17, 2  ;;  %p1342_p0 = scmp.lt.s32.totalorder %s1542_s17, 2 }
  0x13   : > { %p1640_p12 = pnand %p1077_p10, %p139_p11  ;;  %s163_s5 = sshll.u32 %s1893_s2, 4  ;;  %s164_s5 = int_to_ptr.hbm [resolvable:$true] %s163_s5 }
  0x14   : > { %p1653_p2 = pnand %p1342_p0, %p1617_p5  ;;  %s1544_s7 = smov [#allocation8]  }
  0x15   : > { %p1325_p1 = pneg %p1640_p12  ;;  %s165_s8 = sshll.u32 %s1544_s7, 4  ;;  %s166_s8 = int_to_ptr.vmem [resolvable:$true] %s165_s8 }
  0x16   : > { %s1545_s9 = smov [#allocation3]   ;;  %s1546_s10 = smov 128  }
  0x17   : > { %s151_s28 = sshll.u32 %s1901_s0, 4  ;;  %p1326_p4 = pnand %p1325_p1, %p1613_p3  ;;  %s152_s28 = int_to_ptr.vmem [resolvable:$true] %s151_s28 }
  0x18   : > { %s1547_s11 = smov 8   ;;  %s179_s18 = sand.u32 1, %s1530_s14  }
  0x19   : > { %1328 = dma.vmem_to_smem (!%p1326_p4), %s152_s28, 64, %s1545_s9, [#allocation6]  }
  0x1a   : > { %1331 = dma.hbm_to_vmem [thread:$0]  (!%p1326_p4), %s164_s5, 4096, %s166_s8, [#allocation9], %s1546_s10, %s1546_s10, %s1547_s11  }
  0x1b   : > { %s33_s19 = sadd.s32 1, %s1538_s16  ;;  %s1081_s22 = sshll.u32 %s179_s18, 7 }
  0x1c   : > { %p35_p5 = scmp.ge.s32.totalorder %s33_s19, 2  ;;  %s1129_s26 = sshll.u32 %s1538_s16, 7 }
  0x1d   : > { %s183_s27 = scalar_lea.vmem [#allocation7], %s1081_s22  ;;  %s189_s28 = scalar_lea.hbm %s1892_s1, %s1129_s26 }
  0x1e   : > { %s192_s30 = sshll.u32 %s183_s27, 4  ;;  %s1910_s19 = smov (%p35_p5, %s33_s19), 0  ;;  %s193_s30 = int_to_ptr.vmem [resolvable:$true] %s192_s30 }
  0x1f   : > { %s58_s9 = ssub.s32 %s1538_s16, %s1910_s19  ;;  %s190_s5 = sshll.u32 %s189_s28, 4  ;;  %s191_s5 = int_to_ptr.hbm [resolvable:$true] %s190_s5 }
  0x20   : > { %p61_p6 = scmp.eq.s32.totalorder %s58_s9, 0  ;;  %s180_s8 = scalar_lea.sflag [#allocation4], %s179_s18 }
  0x21   : > { %1335 = dma.hbm_to_vmem [thread:$0]  (!%p1653_p2), %s191_s5, 2048, %s193_s30, %s180_s8, %s1546_s10, %s1546_s10, %s1547_s11  }
  0x22   : > { %s1674_s0 = scalar_select %p61_p6, %s1530_s14, %s63_s20  }
  0x23   : > { %204 = sbr.rel (%p1640_p12) target bundleno = 290 (0x122), region = 32 }
  0x28   : > { %1505 = dma.done.wait (%p1613_p3), [#allocation6], 64  }
  0x29   : > { %1507 = vsyncadd (%p1613_p3), [#allocation6], 4294967232  ;;  %s1683_s22 = sand.u32 1, %s1526_s13  }
  0x2a   : > { %s1086_s6 = sshll.u32 %s1683_s22, 7  ;;  %s212_s10 = scalar_lea.sflag [#allocation4], %s1683_s22 }
  0x2b   : > { %s1687_s11 = scalar_lea.vmem [#allocation7], %s1086_s6 }
  0x2c   : > { %1509 = dma.done.wait (%p1623_p7), %s212_s10, 2048  }
  0x2d   : > { %1511 = vsyncadd (%p1623_p7), %s212_s10, 4294965248 }
  0x2e   : > { %1513 = dma.done.wait (%p1613_p3), [#allocation9], 4096  }
  0x2f   : > { %1515 = vsyncadd (%p1613_p3), [#allocation9], 4294963200 }
  0x30   : > { %226 = sfence }
  0x31   : > { %v331_v0 = vld [vmem:[#allocation8 + $0x78] sm:$0xff]  ;;  %v330_v2 = vld [vmem:[#allocation8 + $0x70] sm:$0xff]  ;;  %v329_v4 = vld [vmem:[#allocation8 + $0x68] sm:$0xff]  ;;  %s579_s20 = sld [smem:[#allocation3]]  ;;  %s1306_s27 = smul.u32 192, %s1683_s22 }
  0x32   : > { %v478_v1 = vld [vmem:[#allocation8 + $0xf8] sm:$0xff]  ;;  %332 = vmatpush.msra.mxu0 %v331_v0  ;;  %1274 = vmatpush.msra.mxu2 %v331_v0  ;;  %v477_v3 = vld [vmem:[#allocation8 + $0xf0] sm:$0xff]  ;;  %v476_v5 = vld [vmem:[#allocation8 + $0xe8] sm:$0xff]  ;;  %s1089_s21 = sld [smem:[#allocation3 + $0x80]]  ;;  %s930_s4 = scalar_lea.sflag [#allocation5], %s1683_s22 }
  0x33   : > { %479 = vmatpush.msra.mxu1 %v478_v1  ;;  %1290 = vmatpush.msra.mxu3 %v478_v1  ;;  %v328_v6 = vld [vmem:[#allocation8 + $0x60] sm:$0xff]  ;;  %v327_v8 = vld [vmem:[#allocation8 + $0x58] sm:$0xff]  ;;  %v326_v10 = vld [vmem:[#allocation8 + $0x50] sm:$0xff]  ;;  %s1107_s23 = sld [smem:[#allocation3 + $0x100]]  ;;  %s1746_s30 = scalar_lea.vmem [#allocation10], %s1306_s27 }
  0x34   : > { %333 = vmatpush.msra.mxu0 %v330_v2  ;;  %1275 = vmatpush.msra.mxu2 %v330_v2  ;;  %v475_v7 = vld [vmem:[#allocation8 + $0xe0] sm:$0xff]  ;;  %v474_v9 = vld [vmem:[#allocation8 + $0xd8] sm:$0xff]  ;;  %v473_v11 = vld [vmem:[#allocation8 + $0xd0] sm:$0xff]  ;;  %s1088_s29 = sld [smem:[#allocation3 + $0x1]] }
  0x35   : > { %480 = vmatpush.msra.mxu1 %v477_v3  ;;  %1291 = vmatpush.msra.mxu3 %v477_v3  ;;  %v325_v12 = vld [vmem:[#allocation8 + $0x48] sm:$0xff]  ;;  %v324_v14 = vld [vmem:[#allocation8 + $0x40] sm:$0xff]  ;;  %v323_v16 = vld [vmem:[#allocation8 + $0x38] sm:$0xff]  ;;  %s1090_s18 = sld [smem:[#allocation3 + $0x81]] }
  0x36   : > { %334 = vmatpush.msra.mxu0 %v329_v4  ;;  %1276 = vmatpush.msra.mxu2 %v329_v4  ;;  %v472_v13 = vld [vmem:[#allocation8 + $0xc8] sm:$0xff]  ;;  %v471_v15 = vld [vmem:[#allocation8 + $0xc0] sm:$0xff]  ;;  %v470_v17 = vld [vmem:[#allocation8 + $0xb8] sm:$0xff]  ;;  %s1108_s26 = sld [smem:[#allocation3 + $0x101]] }
  0x37   : > { %481 = vmatpush.msra.mxu1 %v476_v5  ;;  %1292 = vmatpush.msra.mxu3 %v476_v5  ;;  %v322_v18 = vld [vmem:[#allocation8 + $0x30] sm:$0xff]  ;;  %v321_v20 = vld [vmem:[#allocation8 + $0x28] sm:$0xff]  ;;  %v320_v22 = vld [vmem:[#allocation8 + $0x20] sm:$0xff]  ;;  %v1713_v50 = vstv %s579_s20 }
  0x38   : > { %335 = vmatpush.msra.mxu0 %v328_v6  ;;  %1277 = vmatpush.msra.mxu2 %v328_v6  ;;  %v469_v19 = vld [vmem:[#allocation8 + $0xb0] sm:$0xff]  ;;  %v468_v21 = vld [vmem:[#allocation8 + $0xa8] sm:$0xff]  ;;  %v467_v23 = vld [vmem:[#allocation8 + $0xa0] sm:$0xff]  ;;  %v1715_v51 = vstv %s1089_s21 }
  0x39   : > { %482 = vmatpush.msra.mxu1 %v475_v7  ;;  %1293 = vmatpush.msra.mxu3 %v475_v7  ;;  %v319_v24 = vld [vmem:[#allocation8 + $0x18] sm:$0xff]  ;;  %v318_v26 = vld [vmem:[#allocation8 + $0x10] sm:$0xff]  ;;  %v317_v28 = vld [vmem:[#allocation8 + $0x8] sm:$0xff]  ;;  %v1721_v54 = vstv %s1107_s23 }
  0x3a   : > { %336 = vmatpush.msra.mxu0 %v327_v8  ;;  %1278 = vmatpush.msra.mxu2 %v327_v8  ;;  %v466_v25 = vld [vmem:[#allocation8 + $0x98] sm:$0xff]  ;;  %v465_v27 = vld [vmem:[#allocation8 + $0x90] sm:$0xff]  ;;  %v464_v29 = vld [vmem:[#allocation8 + $0x88] sm:$0xff]  ;;  %v1717_v52 = vstv %s1088_s29 }
  0x3b   : > { %483 = vmatpush.msra.mxu1 %v474_v9  ;;  %1294 = vmatpush.msra.mxu3 %v474_v9  ;;  %v316_v30 = vld [vmem:[#allocation8] sm:$0xff]  ;;  %v301_v34 = vld [vmem:[%s1687_s11 + $0x8] sm:$0xff]  ;;  %v302_v36 = vld [vmem:[%s1687_s11 + $0x10] sm:$0xff]  ;;  %v1719_v53 = vstv %s1090_s18 }
  0x3c   : > { %337 = vmatpush.msra.mxu0 %v326_v10  ;;  %1279 = vmatpush.msra.mxu2 %v326_v10  ;;  %v463_v31 = vld [vmem:[#allocation8 + $0x80] sm:$0xff]  ;;  %v309_v35 = vld [vmem:[%s1687_s11 + $0x48] sm:$0xff]  ;;  %v310_v37 = vld [vmem:[%s1687_s11 + $0x50] sm:$0xff]  ;;  %v1723_v55 = vstv %s1108_s26 }
  0x3d   : > { %484 = vmatpush.msra.mxu1 %v473_v11  ;;  %1295 = vmatpush.msra.mxu3 %v473_v11  ;;  %v300_v32 = vld [vmem:[%s1687_s11] sm:$0xff]  ;;  %v303_v38 = vld [vmem:[%s1687_s11 + $0x18] sm:$0xff]  ;;  %v305_v42 = vld [vmem:[%s1687_s11 + $0x28] sm:$0xff] }
  0x3e   : > { %338 = vmatpush.msra.mxu0 %v325_v12  ;;  %1280 = vmatpush.msra.mxu2 %v325_v12  ;;  %v308_v33 = vld [vmem:[%s1687_s11 + $0x40] sm:$0xff]  ;;  %v311_v39 = vld [vmem:[%s1687_s11 + $0x58] sm:$0xff]  ;;  %v313_v43 = vld [vmem:[%s1687_s11 + $0x68] sm:$0xff] }
  0x3f   : > { %485 = vmatpush.msra.mxu1 %v472_v13  ;;  %1296 = vmatpush.msra.mxu3 %v472_v13  ;;  %v304_v40 = vld [vmem:[%s1687_s11 + $0x20] sm:$0xff]  ;;  %v306_v44 = vld [vmem:[%s1687_s11 + $0x30] sm:$0xff]  ;;  %v307_v46 = vld [vmem:[%s1687_s11 + $0x38] sm:$0xff] }
  0x40   : > { %339 = vmatpush.msra.mxu0 %v324_v14  ;;  %1281 = vmatpush.msra.mxu2 %v324_v14  ;;  %v312_v41 = vld [vmem:[%s1687_s11 + $0x60] sm:$0xff]  ;;  %v314_v45 = vld [vmem:[%s1687_s11 + $0x70] sm:$0xff]  ;;  %v315_v47 = vld [vmem:[%s1687_s11 + $0x78] sm:$0xff] }
  0x41   : > { %486 = vmatpush.msra.mxu1 %v471_v15  ;;  %1297 = vmatpush.msra.mxu3 %v471_v15 }
  0x42   : > { %340 = vmatpush.msra.mxu0 %v323_v16  ;;  %1282 = vmatpush.msra.mxu2 %v323_v16 }
  0x43   : > { %487 = vmatpush.msra.mxu1 %v470_v17  ;;  %1298 = vmatpush.msra.mxu3 %v470_v17 }
  0x44   : > { %341 = vmatpush.msra.mxu0 %v322_v18  ;;  %1283 = vmatpush.msra.mxu2 %v322_v18 }
  0x45   : > { %488 = vmatpush.msra.mxu1 %v469_v19  ;;  %1299 = vmatpush.msra.mxu3 %v469_v19 }
  0x46   : > { %342 = vmatpush.msra.mxu0 %v321_v20  ;;  %1284 = vmatpush.msra.mxu2 %v321_v20 }
  0x47   : > { %489 = vmatpush.msra.mxu1 %v468_v21  ;;  %1300 = vmatpush.msra.mxu3 %v468_v21 }
  0x48   : > { %343 = vmatpush.msra.mxu0 %v320_v22  ;;  %1285 = vmatpush.msra.mxu2 %v320_v22 }
  0x49   : > { %490 = vmatpush.msra.mxu1 %v467_v23  ;;  %1301 = vmatpush.msra.mxu3 %v467_v23 }
  0x4a   : > { %344 = vmatpush.msra.mxu0 %v319_v24  ;;  %1286 = vmatpush.msra.mxu2 %v319_v24 }
  0x4b   : > { %491 = vmatpush.msra.mxu1 %v466_v25  ;;  %1302 = vmatpush.msra.mxu3 %v466_v25 }
  0x4c   : > { %345 = vmatpush.msra.mxu0 %v318_v26  ;;  %1287 = vmatpush.msra.mxu2 %v318_v26 }
  0x4d   : > { %492 = vmatpush.msra.mxu1 %v465_v27  ;;  %1303 = vmatpush.msra.mxu3 %v465_v27 }
  0x4e   : > { %346 = vmatpush.msra.mxu0 %v317_v28  ;;  %1288 = vmatpush.msra.mxu2 %v317_v28 }
  0x4f   : > { %493 = vmatpush.msra.mxu1 %v464_v29  ;;  %1304 = vmatpush.msra.mxu3 %v464_v29 }
  0x50   : > { %347 = vmatpush.msra.mxu0 %v316_v30  ;;  %1289 = vmatpush.msra.mxu2 %v316_v30 }
  0x51   : > { %494 = vmatpush.msra.mxu1 %v463_v31  ;;  %1305 = vmatpush.msra.mxu3 %v463_v31 }
  0x52   : > { %348 = vmatmul.f32.vlgmr.msra.gmra.mxu0 %v300_v32  ;;  %372 = vmatmul.f32.vlgmr.msra.gmra.mxu2 %v308_v33 }
  0x53   : > { %495 = vmatmul.f32.vlgmr.msra.gmra.mxu1 %v300_v32  ;;  %519 = vmatmul.f32.vlgmr.msra.gmra.mxu3 %v308_v33 }
  0x5a   : > { %351 = vmatmul.f32.gmra.mxu0 %v301_v34  ;;  %375 = vmatmul.f32.gmra.mxu2 %v309_v35 }
  0x5b   : > { %498 = vmatmul.f32.gmra.mxu1 %v301_v34  ;;  %522 = vmatmul.f32.gmra.mxu3 %v309_v35 }
  0x62   : > { %354 = vmatmul.f32.gmra.mxu0 %v302_v36  ;;  %378 = vmatmul.f32.gmra.mxu2 %v310_v37 }
  0x63   : > { %501 = vmatmul.f32.gmra.mxu1 %v302_v36  ;;  %525 = vmatmul.f32.gmra.mxu3 %v310_v37 }
  0x6a   : > { %357 = vmatmul.f32.gmra.mxu0 %v303_v38  ;;  %381 = vmatmul.f32.gmra.mxu2 %v311_v39 }
  0x6b   : > { %504 = vmatmul.f32.gmra.mxu1 %v303_v38  ;;  %528 = vmatmul.f32.gmra.mxu3 %v311_v39 }
  0x72   : > { %360 = vmatmul.f32.gmra.mxu0 %v304_v40  ;;  %384 = vmatmul.f32.gmra.mxu2 %v312_v41 }
  0x73   : > { %507 = vmatmul.f32.gmra.mxu1 %v304_v40  ;;  %531 = vmatmul.f32.gmra.mxu3 %v312_v41 }
  0x7a   : > { %363 = vmatmul.f32.gmra.mxu0 %v305_v42  ;;  %387 = vmatmul.f32.gmra.mxu2 %v313_v43 }
  0x7b   : > { %510 = vmatmul.f32.gmra.mxu1 %v305_v42  ;;  %534 = vmatmul.f32.gmra.mxu3 %v313_v43 }
  0x82   : > { %366 = vmatmul.f32.gmra.mxu0 %v306_v44  ;;  %390 = vmatmul.f32.gmra.mxu2 %v314_v45 }
  0x83   : > { %513 = vmatmul.f32.gmra.mxu1 %v306_v44  ;;  %537 = vmatmul.f32.gmra.mxu3 %v314_v45 }
  0x8a   : > { %369 = vmatmul.f32.gmra.mxu0 %v307_v46  ;;  %393 = vmatmul.f32.gmra.mxu2 %v315_v47 }
  0x8b   : > { %516 = vmatmul.f32.gmra.mxu1 %v307_v46  ;;  %540 = vmatmul.f32.gmra.mxu3 %v315_v47 }
  0xcf   : > { %v349_v48 = vpop.f32.mrf.mxu0 }
  0xd0   : > { %v496_v49 = vpop.f32.mrf.mxu1  ;;  %v597_v57 = vmul.f32 %v1713_v50, %v349_v48  ;;  %v713_v58 = vmul.f32 %v1715_v51, %v349_v48  ;;  %v830_v62 = vmul.f32 %v1721_v54, %v349_v48 }
  0xd1   : > { %v631_v59 = vmul.f32 %v1717_v52, %v496_v49  ;;  %v747_v60 = vmul.f32 %v1719_v53, %v496_v49  ;;  %v864_v63 = vmul.f32 %v1723_v55, %v496_v49 }
  0xd3   : > { %v647_v6 = vadd.f32 %v631_v59, %v597_v57  ;;  %v763_v7 = vadd.f32 %v747_v60, %v713_v58  ;;  %v880_v10 = vadd.f32 %v864_v63, %v830_v62 }
  0xd5   : > { %v373_v56 = vpop.f32.mrf.mxu2 }
  0xd6   : > { %v520_v61 = vpop.f32.mrf.mxu3  ;;  %v605_v11 = vmul.f32 %v1713_v50, %v373_v56  ;;  %v721_v12 = vmul.f32 %v1715_v51, %v373_v56  ;;  %v838_v18 = vmul.f32 %v1721_v54, %v373_v56 }
  0xd7   : > { %v352_v0 = vpop.f32.mrf.mxu0  ;;  %v639_v14 = vmul.f32 %v1717_v52, %v520_v61  ;;  %v755_v15 = vmul.f32 %v1719_v53, %v520_v61  ;;  %v872_v19 = vmul.f32 %v1723_v55, %v520_v61 }
  0xd8   : > { %v598_v1 = vmul.f32 %v1713_v50, %v352_v0  ;;  %v714_v2 = vmul.f32 %v1715_v51, %v352_v0  ;;  %v831_v3 = vmul.f32 %v1721_v54, %v352_v0  ;;  %v499_v4 = vpop.f32.mrf.mxu1 }
  0xd9   : > { %v632_v5 = vmul.f32 %v1717_v52, %v499_v4  ;;  %v748_v8 = vmul.f32 %v1719_v53, %v499_v4  ;;  %v865_v9 = vmul.f32 %v1723_v55, %v499_v4  ;;  %v655_v32 = vadd.f32 %v639_v14, %v605_v11 }
  0xda   : > { %v771_v33 = vadd.f32 %v755_v15, %v721_v12  ;;  %v888_v35 = vadd.f32 %v872_v19, %v838_v18 }
  0xdb   : > { %v648_v13 = vadd.f32 %v632_v5, %v598_v1  ;;  %v764_v16 = vadd.f32 %v748_v8, %v714_v2  ;;  %v881_v17 = vadd.f32 %v865_v9, %v831_v3 }
  0xdd   : > { %v1134_v20 = vpack.c.bf16 %v648_v13, %v647_v6  ;;  %v376_v21 = vpop.f32.mrf.mxu2  ;;  %v1174_v22 = vpack.c.bf16 %v764_v16, %v763_v7  ;;  %v1214_v23 = vpack.c.bf16 %v881_v17, %v880_v10 }
  0xde   : > { %v606_v24 = vmul.f32 %v1713_v50, %v376_v21  ;;  %v722_v25 = vmul.f32 %v1715_v51, %v376_v21  ;;  %v523_v26 = vpop.f32.mrf.mxu3  ;;  %v839_v27 = vmul.f32 %v1721_v54, %v376_v21 }
  0xdf   : > { %1135 = vst [vmem:[%s1746_s30] sm:$0xff] %v1134_v20   ;;  %v640_v28 = vmul.f32 %v1717_v52, %v523_v26  ;;  %v756_v29 = vmul.f32 %v1719_v53, %v523_v26  ;;  %v873_v30 = vmul.f32 %v1723_v55, %v523_v26  ;;  %v355_v31 = vpop.f32.mrf.mxu0 }
  0xe0   : > { %1258 = vst [vmem:[%s1746_s30 + $0x40] sm:$0xff] %v1174_v22   ;;  %v502_v34 = vpop.f32.mrf.mxu1  ;;  %v599_v43 = vmul.f32 %v1713_v50, %v355_v31  ;;  %v715_v44 = vmul.f32 %v1715_v51, %v355_v31  ;;  %v832_v48 = vmul.f32 %v1721_v54, %v355_v31 }
  0xe1   : > { %1266 = vst [vmem:[%s1746_s30 + $0x80] sm:$0xff] %v1214_v23   ;;  %v656_v36 = vadd.f32 %v640_v28, %v606_v24  ;;  %v772_v37 = vadd.f32 %v756_v29, %v722_v25  ;;  %v889_v38 = vadd.f32 %v873_v30, %v839_v27  ;;  %v633_v45 = vmul.f32 %v1717_v52, %v502_v34 }
  0xe2   : > { %v749_v46 = vmul.f32 %v1719_v53, %v502_v34  ;;  %v866_v49 = vmul.f32 %v1723_v55, %v502_v34 }
  0xe3   : > { %v1154_v39 = vpack.c.bf16 %v656_v36, %v655_v32  ;;  %v1194_v40 = vpack.c.bf16 %v772_v37, %v771_v33  ;;  %v1234_v41 = vpack.c.bf16 %v889_v38, %v888_v35  ;;  %v649_v62 = vadd.f32 %v633_v45, %v599_v43 }
  0xe4   : > { %v765_v63 = vadd.f32 %v749_v46, %v715_v44  ;;  %v882_v2 = vadd.f32 %v866_v49, %v832_v48 }
  0xe5   : > { %1254 = vst [vmem:[%s1746_s30 + $0x20] sm:$0xff] %v1154_v39   ;;  %v379_v42 = vpop.f32.mrf.mxu2 }
  0xe6   : > { %1262 = vst [vmem:[%s1746_s30 + $0x60] sm:$0xff] %v1194_v40   ;;  %v526_v47 = vpop.f32.mrf.mxu3  ;;  %v607_v3 = vmul.f32 %v1713_v50, %v379_v42  ;;  %v723_v4 = vmul.f32 %v1715_v51, %v379_v42  ;;  %v840_v10 = vmul.f32 %v1721_v54, %v379_v42 }
  0xe7   : > { %1270 = vst [vmem:[%s1746_s30 + $0xa0] sm:$0xff] %v1234_v41   ;;  %v358_v56 = vpop.f32.mrf.mxu0  ;;  %v641_v6 = vmul.f32 %v1717_v52, %v526_v47  ;;  %v757_v7 = vmul.f32 %v1719_v53, %v526_v47  ;;  %v874_v11 = vmul.f32 %v1723_v55, %v526_v47 }
  0xe8   : > { %v600_v57 = vmul.f32 %v1713_v50, %v358_v56  ;;  %v716_v58 = vmul.f32 %v1715_v51, %v358_v56  ;;  %v833_v59 = vmul.f32 %v1721_v54, %v358_v56  ;;  %v505_v60 = vpop.f32.mrf.mxu1 }
  0xe9   : > { %v634_v61 = vmul.f32 %v1717_v52, %v505_v60  ;;  %v750_v0 = vmul.f32 %v1719_v53, %v505_v60  ;;  %v867_v1 = vmul.f32 %v1723_v55, %v505_v60  ;;  %v657_v24 = vadd.f32 %v641_v6, %v607_v3 }
  0xea   : > { %v773_v25 = vadd.f32 %v757_v7, %v723_v4  ;;  %v890_v27 = vadd.f32 %v874_v11, %v840_v10 }
  0xeb   : > { %v650_v5 = vadd.f32 %v634_v61, %v600_v57  ;;  %v766_v8 = vadd.f32 %v750_v0, %v716_v58  ;;  %v883_v9 = vadd.f32 %v867_v1, %v833_v59 }
  0xed   : > { %v1139_v12 = vpack.c.bf16 %v650_v5, %v649_v62  ;;  %v382_v13 = vpop.f32.mrf.mxu2  ;;  %v1179_v14 = vpack.c.bf16 %v766_v8, %v765_v63  ;;  %v1219_v15 = vpack.c.bf16 %v883_v9, %v882_v2 }
  0xee   : > { %v608_v16 = vmul.f32 %v1713_v50, %v382_v13  ;;  %v724_v17 = vmul.f32 %v1715_v51, %v382_v13  ;;  %v529_v18 = vpop.f32.mrf.mxu3  ;;  %v841_v19 = vmul.f32 %v1721_v54, %v382_v13 }
  0xef   : > { %1251 = vst [vmem:[%s1746_s30 + $0x8] sm:$0xff] %v1139_v12   ;;  %v642_v20 = vmul.f32 %v1717_v52, %v529_v18  ;;  %v758_v21 = vmul.f32 %v1719_v53, %v529_v18  ;;  %v875_v22 = vmul.f32 %v1723_v55, %v529_v18  ;;  %v361_v23 = vpop.f32.mrf.mxu0 }
  0xf0   : > { %1259 = vst [vmem:[%s1746_s30 + $0x48] sm:$0xff] %v1179_v14   ;;  %v508_v26 = vpop.f32.mrf.mxu1  ;;  %v601_v35 = vmul.f32 %v1713_v50, %v361_v23  ;;  %v717_v36 = vmul.f32 %v1715_v51, %v361_v23  ;;  %v834_v40 = vmul.f32 %v1721_v54, %v361_v23 }
  0xf1   : > { %1267 = vst [vmem:[%s1746_s30 + $0x88] sm:$0xff] %v1219_v15   ;;  %v658_v28 = vadd.f32 %v642_v20, %v608_v16  ;;  %v774_v29 = vadd.f32 %v758_v21, %v724_v17  ;;  %v891_v30 = vadd.f32 %v875_v22, %v841_v19  ;;  %v635_v37 = vmul.f32 %v1717_v52, %v508_v26 }
  0xf2   : > { %v751_v38 = vmul.f32 %v1719_v53, %v508_v26  ;;  %v868_v41 = vmul.f32 %v1723_v55, %v508_v26 }
  0xf3   : > { %v1159_v31 = vpack.c.bf16 %v658_v28, %v657_v24  ;;  %v1199_v32 = vpack.c.bf16 %v774_v29, %v773_v25  ;;  %v1239_v33 = vpack.c.bf16 %v891_v30, %v890_v27  ;;  %v651_v48 = vadd.f32 %v635_v37, %v601_v35 }
  0xf4   : > { %v767_v49 = vadd.f32 %v751_v38, %v717_v36  ;;  %v884_v58 = vadd.f32 %v868_v41, %v834_v40 }
  0xf5   : > { %1255 = vst [vmem:[%s1746_s30 + $0x28] sm:$0xff] %v1159_v31   ;;  %v385_v34 = vpop.f32.mrf.mxu2 }
  0xf6   : > { %1263 = vst [vmem:[%s1746_s30 + $0x68] sm:$0xff] %v1199_v32   ;;  %v532_v39 = vpop.f32.mrf.mxu3  ;;  %v609_v59 = vmul.f32 %v1713_v50, %v385_v34  ;;  %v725_v60 = vmul.f32 %v1715_v51, %v385_v34  ;;  %v842_v2 = vmul.f32 %v1721_v54, %v385_v34 }
  0xf7   : > { %1271 = vst [vmem:[%s1746_s30 + $0xa8] sm:$0xff] %v1239_v33   ;;  %v364_v42 = vpop.f32.mrf.mxu0  ;;  %v643_v62 = vmul.f32 %v1717_v52, %v532_v39  ;;  %v759_v63 = vmul.f32 %v1719_v53, %v532_v39  ;;  %v876_v3 = vmul.f32 %v1723_v55, %v532_v39 }
  0xf8   : > { %v602_v43 = vmul.f32 %v1713_v50, %v364_v42  ;;  %v718_v44 = vmul.f32 %v1715_v51, %v364_v42  ;;  %v835_v45 = vmul.f32 %v1721_v54, %v364_v42  ;;  %v511_v46 = vpop.f32.mrf.mxu1 }
  0xf9   : > { %v636_v47 = vmul.f32 %v1717_v52, %v511_v46  ;;  %v752_v56 = vmul.f32 %v1719_v53, %v511_v46  ;;  %v869_v57 = vmul.f32 %v1723_v55, %v511_v46  ;;  %v659_v16 = vadd.f32 %v643_v62, %v609_v59 }
  0xfa   : > { %v775_v17 = vadd.f32 %v759_v63, %v725_v60  ;;  %v892_v19 = vadd.f32 %v876_v3, %v842_v2 }
  0xfb   : > { %v652_v61 = vadd.f32 %v636_v47, %v602_v43  ;;  %v768_v0 = vadd.f32 %v752_v56, %v718_v44  ;;  %v885_v1 = vadd.f32 %v869_v57, %v835_v45 }
  0xfd   : > { %v1144_v4 = vpack.c.bf16 %v652_v61, %v651_v48  ;;  %v388_v5 = vpop.f32.mrf.mxu2  ;;  %v1184_v6 = vpack.c.bf16 %v768_v0, %v767_v49  ;;  %v1224_v7 = vpack.c.bf16 %v885_v1, %v884_v58 }
  0xfe   : > { %v610_v8 = vmul.f32 %v1713_v50, %v388_v5  ;;  %v726_v9 = vmul.f32 %v1715_v51, %v388_v5  ;;  %v535_v10 = vpop.f32.mrf.mxu3  ;;  %v843_v11 = vmul.f32 %v1721_v54, %v388_v5 }
  0xff   : > { %1252 = vst [vmem:[%s1746_s30 + $0x10] sm:$0xff] %v1144_v4   ;;  %v644_v12 = vmul.f32 %v1717_v52, %v535_v10  ;;  %v760_v13 = vmul.f32 %v1719_v53, %v535_v10  ;;  %v877_v14 = vmul.f32 %v1723_v55, %v535_v10  ;;  %v367_v15 = vpop.f32.mrf.mxu0 }
 0x100   : > { %1260 = vst [vmem:[%s1746_s30 + $0x50] sm:$0xff] %v1184_v6   ;;  %v514_v18 = vpop.f32.mrf.mxu1  ;;  %v603_v27 = vmul.f32 %v1713_v50, %v367_v15  ;;  %v719_v28 = vmul.f32 %v1715_v51, %v367_v15  ;;  %v836_v32 = vmul.f32 %v1721_v54, %v367_v15 }
 0x101   : > { %1268 = vst [vmem:[%s1746_s30 + $0x90] sm:$0xff] %v1224_v7   ;;  %v660_v20 = vadd.f32 %v644_v12, %v610_v8  ;;  %v776_v21 = vadd.f32 %v760_v13, %v726_v9  ;;  %v893_v22 = vadd.f32 %v877_v14, %v843_v11  ;;  %v637_v29 = vmul.f32 %v1717_v52, %v514_v18 }
 0x102   : > { %v753_v30 = vmul.f32 %v1719_v53, %v514_v18  ;;  %v870_v33 = vmul.f32 %v1723_v55, %v514_v18 }
 0x103   : > { %v1164_v23 = vpack.c.bf16 %v660_v20, %v659_v16  ;;  %v1204_v24 = vpack.c.bf16 %v776_v21, %v775_v17  ;;  %v1244_v25 = vpack.c.bf16 %v893_v22, %v892_v19  ;;  %v653_v40 = vadd.f32 %v637_v29, %v603_v27 }
 0x104   : > { %v769_v41 = vadd.f32 %v753_v30, %v719_v28  ;;  %v886_v44 = vadd.f32 %v870_v33, %v836_v32 }
 0x105   : > { %1256 = vst [vmem:[%s1746_s30 + $0x30] sm:$0xff] %v1164_v23   ;;  %v391_v26 = vpop.f32.mrf.mxu2 }
 0x106   : > { %1264 = vst [vmem:[%s1746_s30 + $0x70] sm:$0xff] %v1204_v24   ;;  %v538_v31 = vpop.f32.mrf.mxu3  ;;  %v611_v45 = vmul.f32 %v1713_v50, %v391_v26  ;;  %v727_v46 = vmul.f32 %v1715_v51, %v391_v26  ;;  %v844_v58 = vmul.f32 %v1721_v54, %v391_v26 }
 0x107   : > { %1272 = vst [vmem:[%s1746_s30 + $0xb0] sm:$0xff] %v1244_v25   ;;  %v370_v34 = vpop.f32.mrf.mxu0  ;;  %v645_v48 = vmul.f32 %v1717_v52, %v538_v31  ;;  %v761_v49 = vmul.f32 %v1719_v53, %v538_v31  ;;  %v878_v59 = vmul.f32 %v1723_v55, %v538_v31 }
 0x108   : > { %v604_v35 = vmul.f32 %v1713_v50, %v370_v34  ;;  %v720_v36 = vmul.f32 %v1715_v51, %v370_v34  ;;  %v837_v37 = vmul.f32 %v1721_v54, %v370_v34  ;;  %v517_v38 = vpop.f32.mrf.mxu1 }
 0x109   : > { %v638_v39 = vmul.f32 %v1717_v52, %v517_v38  ;;  %v754_v42 = vmul.f32 %v1719_v53, %v517_v38  ;;  %v871_v43 = vmul.f32 %v1723_v55, %v517_v38  ;;  %v661_v7 = vadd.f32 %v645_v48, %v611_v45 }
 0x10a   : > { %v777_v8 = vadd.f32 %v761_v49, %v727_v46 }
 0x10b   : > { %v654_v47 = vadd.f32 %v638_v39, %v604_v35  ;;  %v770_v56 = vadd.f32 %v754_v42, %v720_v36  ;;  %v887_v57 = vadd.f32 %v871_v43, %v837_v37 }
 0x10d   : > { %v1149_v60 = vpack.c.bf16 %v654_v47, %v653_v40  ;;  %v394_v61 = vpop.f32.mrf.mxu2  ;;  %v1189_v62 = vpack.c.bf16 %v770_v56, %v769_v41  ;;  %v1229_v63 = vpack.c.bf16 %v887_v57, %v886_v44 }
 0x10e   : > { %v612_v0 = vmul.f32 %v1713_v50, %v394_v61  ;;  %v728_v1 = vmul.f32 %v1715_v51, %v394_v61  ;;  %v541_v2 = vpop.f32.mrf.mxu3  ;;  %v845_v3 = vmul.f32 %v1721_v54, %v394_v61  ;;  %v894_v50 = vadd.f32 %v878_v59, %v844_v58 }
 0x10f   : > { %1253 = vst [vmem:[%s1746_s30 + $0x18] sm:$0xff] %v1149_v60   ;;  %v646_v4 = vmul.f32 %v1717_v52, %v541_v2  ;;  %v762_v5 = vmul.f32 %v1719_v53, %v541_v2  ;;  %v879_v6 = vmul.f32 %v1723_v55, %v541_v2 }
 0x110   : > { %1261 = vst [vmem:[%s1746_s30 + $0x58] sm:$0xff] %v1189_v62  }
 0x111   : > { %1269 = vst [vmem:[%s1746_s30 + $0x98] sm:$0xff] %v1229_v63   ;;  %v662_v51 = vadd.f32 %v646_v4, %v612_v0  ;;  %v778_v9 = vadd.f32 %v762_v5, %v728_v1  ;;  %v895_v10 = vadd.f32 %v879_v6, %v845_v3 }
 0x113   : > { %v1169_v11 = vpack.c.bf16 %v662_v51, %v661_v7  ;;  %v1209_v12 = vpack.c.bf16 %v778_v9, %v777_v8  ;;  %v1249_v54 = vpack.c.bf16 %v895_v10, %v894_v50 }
 0x115   : > { %1257 = vst [vmem:[%s1746_s30 + $0x38] sm:$0xff] %v1169_v11  }
 0x116   : > { %1265 = vst [vmem:[%s1746_s30 + $0x78] sm:$0xff] %v1209_v12  }
 0x117   : > { %1273 = vst [vmem:[%s1746_s30 + $0xb8] sm:$0xff] %v1249_v54  }
 0x118   : > { %s1130_s7 = sshll.u32 %s1534_s15, 6  ;;  %s952_s28 = sshll.u32 %s1746_s30, 4  ;;  %s953_s28 = int_to_ptr.vmem [resolvable:$true] %s952_s28 }
 0x119   : > { %s941_s8 = scalar_lea.hbm %s1894_s3, %s1130_s7  ;;  %s1548_s10 = smov 1024  }
 0x11a   : > { %s954_s6 = sshll.u32 %s941_s8, 4  ;;  %1317 = sst [smem:[#allocation12]] (%p1627_p8), %s1548_s10  ;;  %s955_s6 = int_to_ptr.hbm [resolvable:$true] %s954_s6 }
 0x11b   : > { %s1549_s22 = smov 2048   ;;  %s1550_s11 = smov 16  }
 0x11c   : > { %1318 = sst [smem:[#allocation12 + $0x1]] (%p1627_p8), %s1549_s22  ;;  %s1551_s15 = smov 64  }
 0x11d   : > { %1319 = sst [smem:[#allocation12 + $0x2]] (%p1627_p8), %s1550_s11  ;;  %s1552_s20 = smov 4  }
 0x11e   : > { %1320 = sst [smem:[#allocation12 + $0x3]] (%p1627_p8), %s1551_s15  ;;  %s1553_s21 = smov [#allocation11]  }
 0x11f   : > { %1321 = sst [smem:[#allocation12 + $0x4]] (%p1627_p8), %s1551_s15  ;;  %s1554_s23 = smov 0  }
 0x120   : > { %1322 = sst [smem:[#allocation12 + $0x5]] (%p1627_p8), %s1552_s20 }
 0x121   : > { %1323 = dma.general (%p1627_p8), %s953_s28, 3072, %s955_s6, %s930_s4, %s1553_s21, [#allocation12], %s1554_s23, 0  }
 0x122 PF: > { %s982_s29 = sand.u32 1, %s1522_s12   ;;  %p1337_p3 = pnand %p1080_p13, %p1631_p9 }
 0x123   : > { %s983_s18 = scalar_lea.sflag [#allocation5], %s982_s29 }
 0x124   : > { %p1338_p7 = pneg %p1337_p3 }
 0x126   : > { %1517 = dma.done.wait (%p1338_p7), %s983_s18, 3072  }
 0x127   : > { %1519 = vsyncadd (%p1338_p7), %s983_s18, 4294964224  ;;  %s21_s17 = sadd.s32 1, %s1542_s17   ;;  %s1904_s12 = smov %s1526_s13 }
 0x128   : > { %p18_p10 = scmp.ge.s32.totalorder %s21_s17, 4   ;;  %s1905_s13 = smov %s1530_s14 }
 0x129   : > { %s1906_s14 = smov %s1674_s0  ;;  %s1907_s15 = smov %s1538_s16 }
 0x12a   : > { %s1908_s16 = smov %s1910_s19  ;;  %20 = sbr.rel (!%p18_p10) target bundleno = 10 (0xa), region = 104 }
 0x12f   :  { %989 = vsyncpa [#allocation4], 1 }
 0x130   :  { %991 = vsyncpa [#allocation4 + $0x1], 1 }
 0x131   :  { %992 = vsyncpa [#allocation9], 1 }
 0x132   :  { %993 = vsyncpa [#allocation5], 1 }
 0x133   :  { %995 = vsyncpa [#allocation5 + $0x1], 1 }
 0x134   :  { %996 = vsyncpa [#allocation6], 1 }
 0x135   :  { %998 = vsyncpa [#allocation6 + $0x1], 1 }

</bundles_post_ra>
